<compile_context>
chip_gen: v6e
topology: v6e:2x2x1
jax: 0.10.0
libtpu: 0.0.40
codegen_flags: <defaults>
</compile_context>

<pallas_src>
import jax
import jax.numpy as jnp
from jax.experimental import pallas as pl
from jax.experimental.pallas import tpu as pltpu


_NEG_BIG = -1.0e30                       # finite "minus infinity" (exp(m_old-m_new) never NaN)
_STREAM_VMEM_BUDGET = 12 * 1024 * 1024   # in-flight stream-buffer budget (< v5e 16 MiB default)


def _num_tensorcores():
    """TensorCores visible to one program on this chip (v7x / megacore: 2, else 1)."""
    try:
        kind = jax.devices()[0].device_kind.lower()
    except Exception:
        return 1
    return 2 if any(t in kind for t in ("v7", "v4", "v5p")) else 1


def _find_divisor(rows, max_rows, row_align, even_chunks):
    """Largest s <= max_rows, multiple of row_align, dividing rows (optionally with an
    even chunk count so a 2-way 'parallel' outer split balances). None if none exists."""
    top = (min(max_rows, rows) // row_align) * row_align
    for cand in range(top, row_align - 1, -row_align):
        if rows % cand:
            continue
        if even_chunks and (rows // cand) % 2:
            continue
        return cand
    return None


def _plan_tiling(n, b, itemsizes, num_tc, budget_bytes):
    """Choose (lane, s, n_outer, n_inner, n_padded) for a (B, n) class dimension.

    The class dim is viewed as (rows, lane): lane (multiple of 128) maps to vector
    lanes, rows map to sublanes; each grid step streams one dense (B, s, lane) block per
    input stream.  Sizing is byte-aware (`itemsizes` = per-stream element sizes) and is
    budgeted against `budget_bytes` of in-flight buffers assuming up to triple
    buffering, so it stays under every chip's scoped-VMEM default.  A 2-way outer split
    is only planned when the chip has 2 TensorCores.
    """
    lane = None
    for c in (1024, 512, 256, 128):                  # prefer >= 8 sublane rows
        if n % c == 0 and n // c >= 8:
            lane = c
            break
    if lane is None:
        for c in (1024, 512, 256, 128):
            if n % c == 0:
                lane = c
                break
    if lane is None:
        lane = 128                                    # ragged n: pad up to a lane multiple
    rows = -(-n // lane)

    # Native tile is (8,128) for 32-bit, (16,128) for bf16, (32,128) for 8-bit dtypes.
    row_align = max(8, 32 // min(itemsizes))
    bytes_per_row = lane * b * sum(itemsizes)         # one class-row across all streams
    max_rows = budget_bytes // (3 * bytes_per_row)    # assume up to 3 buffers per stream
    max_rows = max(row_align, (max_rows // row_align) * row_align)

    s = None
    if num_tc >= 2:                                   # keep both TensorCores busy (v7x)
        s = _find_divisor(rows, max_rows, row_align, even_chunks=True)
    if s is None:
        if rows <= max_rows:
            s = rows                                  # single chunk: block == full extent
        else:
            s = _find_divisor(rows, max_rows, row_align, even_chunks=False)
    padded_rows = rows
    if s is None:
        # No aligned divisor: pad the row count.
        # TODO(synk): handle this tail in-kernel instead of jnp.pad (extra HBM pass);
        # the canonical CLIPort shapes (160*128*{1,36}) never hit this branch.
        s = max_rows
        padded_rows = -(-rows // s) * s
    n_chunks = padded_rows // s
    n_outer = 2 if (num_tc >= 2 and n_chunks >= 2 and n_chunks % 2 == 0) else 1
    n_inner = n_chunks // n_outer
    return lane, s, n_outer, n_inner, padded_rows * lane


def _stream_spec(shape, index_map, buffers):
    """BlockSpec for a streamed input; requests triple buffering when useful."""
    if buffers > 2:
        try:
            return pl.BlockSpec(shape, index_map, pipeline_mode=pl.Buffered(buffers))
        except TypeError:                             # older jax: fall back to 2 buffers
            pass
    return pl.BlockSpec(shape, index_map)


def _lse_stream_kernel(pred_ref, stat_ref):
    """Pure online logsumexp over the class dim, streamed in (B, S, LANE) blocks.
    stat_ref packs the per-(row, lane) partials [m; l] as one resident (1, 2*B, LANE)
    block per outer chunk.  No label math in-kernel (moved to the JAX epilogue)."""
    i = pl.program_id(1)
    B, _, lane = pred_ref.shape

    @pl.when(i == 0)
    def _():
        stat_ref[0, :B] = jnp.full((B, lane), _NEG_BIG, jnp.float32)
        stat_ref[0, B:] = jnp.zeros((B, lane), jnp.float32)

    p = pred_ref[...].astype(jnp.float32)             # (B, S, LANE)
    m_old = stat_ref[0, :B]                           # (B, LANE) running max
    m_new = jnp.maximum(m_old, p.max(axis=1))
    stat_ref[0, B:] = stat_ref[0, B:] * jnp.exp(m_old - m_new) + \
        jnp.exp(p - m_new[:, None, :]).sum(axis=1)
    stat_ref[0, :B] = m_new


def _xent_dense_kernel(pred_ref, lab_ref, stat_ref):
    """Dense-label cross-entropy statistics: streams logits + labels and accumulates
    [m; l; sum(label*logit); sum(label)] packed into one (1, 4*B, LANE) resident block."""
    i = pl.program_id(1)
    B, _, lane = pred_ref.shape

    @pl.when(i == 0)
    def _():
        stat_ref[0, :B] = jnp.full((B, lane), _NEG_BIG, jnp.float32)
        stat_ref[0, B:] = jnp.zeros((3 * B, lane), jnp.float32)

    p = pred_ref[...].astype(jnp.float32)             # (B, S, LANE)
    lab = lab_ref[...].astype(jnp.float32)

    m_old = stat_ref[0, :B]
    m_new = jnp.maximum(m_old, p.max(axis=1))
    stat_ref[0, B:2 * B] = stat_ref[0, B:2 * B] * jnp.exp(m_old - m_new) + \
        jnp.exp(p - m_new[:, None, :]).sum(axis=1)
    stat_ref[0, :B] = m_new
    stat_ref[0, 2 * B:3 * B] = stat_ref[0, 2 * B:3 * B] + (lab * p).sum(axis=1)
    stat_ref[0, 3 * B:4 * B] = stat_ref[0, 3 * B:4 * B] + lab.sum(axis=1)


def _merge_lse(m, l):
    """Merge per-(outer-chunk, lane) online-lse partials -> per-row logsumexp (B,)."""
    m_row = m.max(axis=(0, 2))
    l_row = (l * jnp.exp(m - m_row[None, :, None])).sum(axis=(0, 2))
    return m_row + jnp.log(l_row)


def _lse_rows(pred, *, budget_bytes=_STREAM_VMEM_BUDGET):
    """Per-row logsumexp(pred, axis=-1) via the streaming Pallas kernel."""
    B, N = pred.shape
    lane, s, n_outer, n_inner, n_pad = _plan_tiling(
        N, B, (jnp.dtype(pred.dtype).itemsize,), _num_tensorcores(), budget_bytes)
    if n_pad != N:
        # TODO(synk): ragged class counts pay one extra HBM pass here; canonical
        # CLIPort shapes are lane-aligned and never hit this.
        pred = jnp.pad(pred, ((0, 0), (0, n_pad - N)),
                       constant_values=jnp.asarray(_NEG_BIG, pred.dtype))
    pred3 = pred.reshape(B, n_pad // lane, lane)      # free bitcast when N % lane == 0
    buffers = 3 if n_inner >= 3 else 2
    idx = lambda o, i: (0, o * n_inner + i, 0)
    stat = pl.pallas_call(
        _lse_stream_kernel,
        out_shape=jax.ShapeDtypeStruct((n_outer, 2 * B, lane), jnp.float32),
        grid_spec=pltpu.PrefetchScalarGridSpec(
            num_scalar_prefetch=0,
            grid=(n_outer, n_inner),
            in_specs=[_stream_spec((B, s, lane), idx, buffers)],
            out_specs=pl.BlockSpec((1, 2 * B, lane), lambda o, i: (o, 0, 0)),
        ),
        compiler_params=pltpu.CompilerParams(
            dimension_semantics=("parallel", "arbitrary"),
            vmem_limit_bytes=32 * 1024 * 1024),
    )(pred3)
    return _merge_lse(stat[:, :B], stat[:, B:])


def _xent_dense_rows(pred, labels, *, budget_bytes=_STREAM_VMEM_BUDGET):
    """Per-row loss (B,): -sum_j labels[b, j] * log_softmax(pred[b])[j]."""
    B, N = pred.shape
    itemsizes = (jnp.dtype(pred.dtype).itemsize, jnp.dtype(labels.dtype).itemsize)
    lane, s, n_outer, n_inner, n_pad = _plan_tiling(
        N, B, itemsizes, _num_tensorcores(), budget_bytes)
    if n_pad != N:
        pred = jnp.pad(pred, ((0, 0), (0, n_pad - N)),
                       constant_values=jnp.asarray(_NEG_BIG, pred.dtype))
        labels = jnp.pad(labels, ((0, 0), (0, n_pad - N)))
    rows = n_pad // lane
    pred3 = pred.reshape(B, rows, lane)
    lab3 = labels.reshape(B, rows, lane)
    buffers = 3 if n_inner >= 3 else 2
    idx = lambda o, i: (0, o * n_inner + i, 0)
    stat = pl.pallas_call(
        _xent_dense_kernel,
        out_shape=jax.ShapeDtypeStruct((n_outer, 4 * B, lane), jnp.float32),
        grid_spec=pltpu.PrefetchScalarGridSpec(
            num_scalar_prefetch=0,
            grid=(n_outer, n_inner),
            in_specs=[_stream_spec((B, s, lane), idx, buffers),
                      _stream_spec((B, s, lane), idx, buffers)],
            out_specs=pl.BlockSpec((1, 4 * B, lane), lambda o, i: (o, 0, 0)),
        ),
        compiler_params=pltpu.CompilerParams(
            dimension_semantics=("parallel", "arbitrary"),
            vmem_limit_bytes=32 * 1024 * 1024),
    )(pred3, lab3)
    lse = _merge_lse(stat[:, :B], stat[:, B:2 * B])
    slp_row = stat[:, 2 * B:3 * B].sum(axis=(0, 2))
    sl_row = stat[:, 3 * B:4 * B].sum(axis=(0, 2))
    return lse * sl_row - slp_row


def cross_entropy_with_logits(pred, labels, reduction="sum", *,
                              budget_bytes=_STREAM_VMEM_BUDGET):
    """Pallas-backed TransporterAgent.cross_entropy_with_logits.
    bf16 pred/labels are accepted at the boundary (accumulation stays f32 in-kernel)."""
    B, N = pred.shape
    row_loss = _xent_dense_rows(pred, labels, budget_bytes=budget_bytes)
    if reduction == "sum":
        return row_loss.sum() / B
    elif reduction == "mean":
        return row_loss.sum() / (B * N)               # torch x.mean() averages over B*N
    else:
        raise NotImplementedError()


def attn_criterion(inp_img, out_logits, p, n_rotations=1, *,
                   budget_bytes=_STREAM_VMEM_BUDGET):
    """TransporterAgent.attn_criterion loss.  The dense one-hot label is never
    materialized or streamed: the kernel is a pure online logsumexp; the label-weighted
    terms are a tiny B x (picks*n_rotations) gather + analytic count in plain JAX.

    Faithful to the numpy quirk `label[:, p[:, 1], p[:, 0]] = 1`: every batch row is
    labeled with the union of ALL B pick pixels (each counted once) x all rotations.
    TODO(synk): assumes the class dim is flattened (H, W, n_rotations) with rotation
    fastest-varying; verify against the real attention head's output layout.
    """
    B, H, W, _ = inp_img.shape
    assert out_logits.shape == (B, H * W * n_rotations)
    pick_flat = p[:, 1].astype(jnp.int32) * W + p[:, 0].astype(jnp.int32)       # (B,)
    lse = _lse_rows(out_logits, budget_bytes=budget_bytes)                      # (B,)
    eq = pick_flat[:, None] == pick_flat[None, :]
    keep = (jnp.argmax(eq, axis=1) == jnp.arange(B)).astype(jnp.float32)        # dedup
    hot_idx = (pick_flat[:, None] * n_rotations
               + jnp.arange(n_rotations, dtype=jnp.int32)[None, :]).reshape(-1)
    hot = jnp.take(out_logits, hot_idx, axis=1).astype(jnp.float32)             # (B, B*R)
    slp_row = (hot * jnp.repeat(keep, n_rotations)[None, :]).sum(axis=1)        # (B,)
    sl_row = keep.sum() * n_rotations                                           # scalar
    row_loss = lse * sl_row - slp_row
    return row_loss.sum() / B


def transport_criterion(inp_img, out_logits, q, theta, n_rotations, *,
                        budget_bytes=_STREAM_VMEM_BUDGET):
    """TransporterAgent.transport_criterion loss (criterion math only; backprop,
    optimizer step and error metrics are out of scope).  Label layout follows the
    module: (H, W, R) one-hot at (q[0], q[1], itheta), transposed to (R, H, W)."""
    H, W = inp_img.shape[:2]
    flat = out_logits.reshape(1, -1)
    itheta = jnp.round(theta / (2 * jnp.pi / n_rotations)).astype(jnp.int32) % n_rotations
    hot = itheta * (H * W) + q[0].astype(jnp.int32) * W + q[1].astype(jnp.int32)
    lse = _lse_rows(flat, budget_bytes=budget_bytes)[0]
    hot_logit = jnp.take(flat[0], hot).astype(jnp.float32)
    return lse - hot_logit                            # single hot class; 'sum' / 1


def _reference_loss(pred, labels, reduction="sum"):
    logp = jax.nn.log_softmax(pred.astype(jnp.float32), axis=-1)
    x = -labels.astype(jnp.float32) * logp
    if reduction == "sum":
        return x.sum() / labels.shape[0]
    return x.mean()


if __name__ == "__main__":
    key = jax.random.PRNGKey(0)
    k1, k2, k3, k4, k5, k6, k7, k8, k9, k10 = jax.random.split(key, 10)

    # --- 1) attn_criterion at small shapes (B=2, 16x16 image, n_rotations=1) ---------
    B, H, W, C, R = 2, 16, 16, 6, 1
    N = H * W * R                                                   # 256 classes
    inp_img = jax.random.normal(k1, (B, H, W, C), jnp.float32)
    logits = jax.random.normal(k2, (B, N), jnp.float32)
    p0 = jnp.stack([jax.random.randint(k3, (B,), 0, W),
                    jax.random.randint(k4, (B,), 0, H)], axis=-1).astype(jnp.int32)
    label = jnp.zeros((B, H, W, R), jnp.float32)
    label = label.at[:, p0[:, 1], p0[:, 0]].set(1.0).reshape(B, -1)  # numpy-quirk label

    loss_attn = jax.block_until_ready(attn_criterion(inp_img, logits, p0, n_rotations=R))
    ref_attn = _reference_loss(logits, label, "sum")
    assert jnp.allclose(loss_attn, ref_attn, rtol=1e-5, atol=1e-4), (loss_attn, ref_attn)

    # --- 2) generic dense-label path, both reductions ---------------------------------
    loss_sum = jax.block_until_ready(cross_entropy_with_logits(logits, label, "sum"))
    loss_mean = jax.block_until_ready(cross_entropy_with_logits(logits, label, "mean"))
    assert jnp.allclose(loss_sum, _reference_loss(logits, label, "sum"),
                        rtol=1e-5, atol=1e-4), loss_sum
    assert jnp.allclose(loss_mean, _reference_loss(logits, label, "mean"),
                        rtol=1e-5, atol=1e-6), loss_mean

    # --- 3) bf16 logits at the pallas_call boundary ------------------------------------
    logits_bf16 = logits.astype(jnp.bfloat16)
    loss_bf16_a = jax.block_until_ready(attn_criterion(inp_img, logits_bf16, p0, n_rotations=R))
    loss_bf16_d = jax.block_until_ready(cross_entropy_with_logits(logits_bf16, label, "sum"))
    ref_bf16 = _reference_loss(logits_bf16.astype(jnp.float32), label, "sum")
    assert jnp.allclose(loss_bf16_a, ref_bf16, rtol=1e-5, atol=1e-4), (loss_bf16_a, ref_bf16)
    assert jnp.allclose(loss_bf16_d, ref_bf16, rtol=1e-5, atol=1e-4), (loss_bf16_d, ref_bf16)

    # --- 4) ragged class count (padded tail path), sum and mean reductions -------------
    N2 = 200
    pred2 = jax.random.normal(k5, (B, N2), jnp.float32)
    lab2 = jax.nn.softmax(jax.random.normal(k6, (B, N2), jnp.float32), axis=-1)
    loss2_sum = jax.block_until_ready(cross_entropy_with_logits(pred2, lab2, "sum"))
    loss2_mean = jax.block_until_ready(cross_entropy_with_logits(pred2, lab2, "mean"))
    assert jnp.allclose(loss2_sum, _reference_loss(pred2, lab2, "sum"),
                        rtol=1e-5, atol=1e-4), loss2_sum
    assert jnp.allclose(loss2_mean, _reference_loss(pred2, lab2, "mean"),
                        rtol=1e-5, atol=1e-6), loss2_mean

    # --- 5) multi-chunk grid with a forced-small budget (exercises the online merge,
    #        the 2-way outer split on 2-TC chips, and Buffered(3) on 1-TC chips) --------
    Hb, Wb, Rb = 64, 128, 8
    Nb = Hb * Wb * Rb                                               # 65536 classes
    logits_b = jax.random.normal(k7, (1, Nb), jnp.float32)
    img_b = jnp.zeros((1, Hb, Wb, C), jnp.float32)
    pb = jnp.stack([jax.random.randint(k8, (1,), 0, Wb),
                    jax.random.randint(k9, (1,), 0, Hb)], axis=-1).astype(jnp.int32)
    label_b = jnp.zeros((1, Hb, Wb, Rb), jnp.float32)
    label_b = label_b.at[:, pb[:, 1], pb[:, 0]].set(1.0).reshape(1, -1)
    small_budget = 192 * 1024
    loss_b = jax.block_until_ready(
        attn_criterion(img_b, logits_b, pb, n_rotations=Rb, budget_bytes=small_budget))
    loss_b_dense = jax.block_until_ready(
        cross_entropy_with_logits(logits_b, label_b, "sum", budget_bytes=small_budget))
    ref_b = _reference_loss(logits_b, label_b, "sum")
    assert jnp.allclose(loss_b, ref_b, rtol=1e-5, atol=1e-3), (loss_b, ref_b)
    assert jnp.allclose(loss_b_dense, ref_b, rtol=1e-5, atol=1e-3), (loss_b_dense, ref_b)

    # --- 6) transport_criterion (single-hot, rotation-major layout) ---------------------
    Rt = 4
    img_t = jnp.zeros((H, W, C), jnp.float32)
    out_t = jax.random.normal(k10, (Rt, H, W), jnp.float32)
    q = jnp.array([5, 9], jnp.int32)
    theta = 1.234
    itheta_ref = int(round(theta / (2 * 3.141592653589793 / Rt))) % Rt
    label_t = jnp.zeros((H, W, Rt), jnp.float32).at[q[0], q[1], itheta_ref].set(1.0)
    label_t = jnp.transpose(label_t, (2, 0, 1)).reshape(1, -1)
    loss_t = jax.block_until_ready(transport_criterion(img_t, out_t, q, theta, Rt))
    ref_t = _reference_loss(out_t.reshape(1, -1), label_t, "sum")
    assert jnp.allclose(loss_t, ref_t, rtol=1e-5, atol=1e-4), (loss_t, ref_t)

    print("KERNEL_OK")
</pallas_src>

<mosaic_0001>
module attributes {stable_mosaic.version = 11 : i64} {
  func.func @_lse_stream_kernel(%arg0: i32, %arg1: i32, %arg2: memref<2x1x256xf32, #tpu.memory_space<vmem>>, %arg3: memref<1x4x256xf32, #tpu.memory_space<vmem>>) attributes {dimension_semantics = [#tpu.dimension_semantics<parallel>, #tpu.dimension_semantics<arbitrary>], iteration_bounds = array<i64: 1, 1>, scalar_prefetch = 0 : i64, scratch_operands = 0 : i64, tpu.core_type = #tpu.core_type<tc>, window_params = [{transform_indices = @transform_0, window_bounds = array<i64: 2, 1, 256>}, {transform_indices = @transform_1, window_bounds = array<i64: 1, 4, 256>}]} {
    %c0_i32 = arith.constant 0 : i32
    %0 = arith.cmpi eq, %arg1, %c0_i32 : i32
    %1 = arith.extui %0 : i1 to i32
    %c0_i32_0 = arith.constant 0 : i32
    %2 = arith.cmpi ne, %1, %c0_i32_0 : i32
    scf.if %2 {
      %cst_15 = arith.constant -1.000000e+30 : f32
      %24 = vector.broadcast %cst_15 : f32 to vector<2x256xf32>
      %c0_16 = arith.constant 0 : index
      %c0_17 = arith.constant 0 : index
      %c0_18 = arith.constant 0 : index
      %25 = vector.load %arg3[%c0_16, %c0_17, %c0_18] : memref<1x4x256xf32, #tpu.memory_space<vmem>>, vector<1x2x256xf32>
      %26 = vector.shape_cast %25 : vector<1x2x256xf32> to vector<2x256xf32>
      %27 = vector.shape_cast %24 : vector<2x256xf32> to vector<1x2x256xf32>
      tpu.vector_store %arg3[%c0_16, %c0_17, %c0_18], %27 {strides = array<i32>} : memref<1x4x256xf32, #tpu.memory_space<vmem>>, vector<1x2x256xf32>,
      %cst_19 = arith.constant 0.000000e+00 : f32
      %28 = vector.broadcast %cst_19 : f32 to vector<2x256xf32>
      %c0_20 = arith.constant 0 : index
      %c2_21 = arith.constant 2 : index
      %c0_22 = arith.constant 0 : index
      %29 = vector.load %arg3[%c0_20, %c2_21, %c0_22] : memref<1x4x256xf32, #tpu.memory_space<vmem>>, vector<1x2x256xf32>
      %30 = vector.shape_cast %29 : vector<1x2x256xf32> to vector<2x256xf32>
      %31 = vector.shape_cast %28 : vector<2x256xf32> to vector<1x2x256xf32>
      tpu.vector_store %arg3[%c0_20, %c2_21, %c0_22], %31 {strides = array<i32>} : memref<1x4x256xf32, #tpu.memory_space<vmem>>, vector<1x2x256xf32>,
    } else {
    }
    %c0 = arith.constant 0 : index
    %c0_1 = arith.constant 0 : index
    %c0_2 = arith.constant 0 : index
    %3 = vector.load %arg2[%c0, %c0_1, %c0_2] : memref<2x1x256xf32, #tpu.memory_space<vmem>>, vector<2x1x256xf32>
    %c0_3 = arith.constant 0 : index
    %c0_4 = arith.constant 0 : index
    %c0_5 = arith.constant 0 : index
    %4 = vector.load %arg3[%c0_3, %c0_4, %c0_5] : memref<1x4x256xf32, #tpu.memory_space<vmem>>, vector<1x2x256xf32>
    %5 = vector.shape_cast %4 : vector<1x2x256xf32> to vector<2x256xf32>
    %cst = arith.constant dense<0xFF800000> : vector<2x256xf32>
    %6 = vector.multi_reduction <maximumf>, %3, %cst [1] : vector<2x1x256xf32> to vector<2x256xf32>
    %7 = arith.maximumf %5, %6 : vector<2x256xf32>
    %c0_6 = arith.constant 0 : index
    %c2 = arith.constant 2 : index
    %c0_7 = arith.constant 0 : index
    %8 = vector.load %arg3[%c0_6, %c2, %c0_7] : memref<1x4x256xf32, #tpu.memory_space<vmem>>, vector<1x2x256xf32>
    %9 = vector.shape_cast %8 : vector<1x2x256xf32> to vector<2x256xf32>
    %10 = arith.subf %5, %7 : vector<2x256xf32>
    %11 = math.exp %10 : vector<2x256xf32>
    %12 = arith.mulf %9, %11 : vector<2x256xf32>
    %13 = vector.shape_cast %7 : vector<2x256xf32> to vector<2x1x256xf32>
    %14 = arith.subf %3, %13 : vector<2x1x256xf32>
    %15 = math.exp %14 : vector<2x1x256xf32>
    %cst_8 = arith.constant dense<0.000000e+00> : vector<2x256xf32>
    %16 = vector.multi_reduction <add>, %15, %cst_8 [1] : vector<2x1x256xf32> to vector<2x256xf32>
    %17 = arith.addf %12, %16 : vector<2x256xf32>
    %c0_9 = arith.constant 0 : index
    %c2_10 = arith.constant 2 : index
    %c0_11 = arith.constant 0 : index
    %18 = vector.load %arg3[%c0_9, %c2_10, %c0_11] : memref<1x4x256xf32, #tpu.memory_space<vmem>>, vector<1x2x256xf32>
    %19 = vector.shape_cast %18 : vector<1x2x256xf32> to vector<2x256xf32>
    %20 = vector.shape_cast %17 : vector<2x256xf32> to vector<1x2x256xf32>
    tpu.vector_store %arg3[%c0_9, %c2_10, %c0_11], %20 {strides = array<i32>} : memref<1x4x256xf32, #tpu.memory_space<vmem>>, vector<1x2x256xf32>,
    %c0_12 = arith.constant 0 : index
    %c0_13 = arith.constant 0 : index
    %c0_14 = arith.constant 0 : index
    %21 = vector.load %arg3[%c0_12, %c0_13, %c0_14] : memref<1x4x256xf32, #tpu.memory_space<vmem>>, vector<1x2x256xf32>
    %22 = vector.shape_cast %21 : vector<1x2x256xf32> to vector<2x256xf32>
    %23 = vector.shape_cast %7 : vector<2x256xf32> to vector<1x2x256xf32>
    tpu.vector_store %arg3[%c0_12, %c0_13, %c0_14], %23 {strides = array<i32>} : memref<1x4x256xf32, #tpu.memory_space<vmem>>, vector<1x2x256xf32>,
    return
  }
  func.func @transform_0(%arg0: i32, %arg1: i32) -> (i32, i32, i32) {
    %c1_i32 = arith.constant 1 : i32
    %0 = arith.muli %arg0, %c1_i32 : i32
    %1 = arith.addi %0, %arg1 : i32
    %c0_i32 = arith.constant 0 : i32
    %c0_i32_0 = arith.constant 0 : i32
    %c0_i32_1 = arith.constant 0 : i32
    return %c0_i32, %1, %c0_i32_0 : i32, i32, i32
  }
  func.func @transform_1(%arg0: i32, %arg1: i32) -> (i32, i32, i32) {
    %c0_i32 = arith.constant 0 : i32
    %c0_i32_0 = arith.constant 0 : i32
    %c0_i32_1 = arith.constant 0 : i32
    return %arg0, %c0_i32, %c0_i32_0 : i32, i32, i32
  }
}

</mosaic_0001>

<bundles_post_ra>
// kernel: tpu_custom_call.1
= control target key start
LH: loop header
LB: loop body
LE: loop exit
PB: predicated region body
PF: predicated region fallthrough
CT: control target
= control target key end

     0   :  { %6 = vsyncpa [#allocation3], 0  ;;  %s231_s0 = inlined_call_operand.hbm [shape: f32[2,1,256], index: 0, kind: input, shape index: {}]   ;;  %s232_s1 = inlined_call_operand.hbm [shape: f32[1,4,256], index: 1, kind: output, shape index: {}]  }
   0x1   :  { %7 = vsyncpa [#allocation4], 0  ;;  %s207_s6 = smov [#allocation2]  }
   0x2   :  { %s17_s7 = sshll.u32 %s207_s6, 4  ;;  %s18_s7 = int_to_ptr.vmem [resolvable:$true] %s17_s7 }
   0x3   :  { %s171_s8 = scalar_lea.vmem %s18_s7, 64  ;;  %p176_p1 = scmp.lt.s32.totalorder %s18_s7, %s18_s7 }
   0x4   :  { %p172_p0 = scmp.ne.s32.totalorder %s18_s7, %s171_s8  ;;  %p177_p2 = scmp.lt.s32.totalorder %s171_s8, %s171_s8 }
   0x6   :  { %p178_p3 = por %p177_p2, %p176_p1 }
   0x8   :  { %p179_p4 = pnand %p178_p3, %p172_p0 }
   0xa   :  { %182 = shalt.err (!%p179_p4)
}
   0xb   :  { %s208_s9 = smov 32   ;;  %s209_s10 = smov 2  }
   0xc   :  { %23 = dma.hbm_to_vmem [thread:$0]  %s231_s0, 64, %s18_s7, [#allocation3], %s208_s9, %s208_s9, %s209_s10  }
   0xd   :  { %203 = dma.done.wait [#allocation3], 64  }
   0xe   :  { %204 = vsyncadd [#allocation3], 4294967232  ;;  %v42_v0 = vlaneseq  ;;  %v210_v1 = vmov -1e+30   ;;  %v211_v2 = vmov 1935823168  }
   0xf   :  { %32 = vst [vmem:[#allocation5] sm:$0x33] %v210_v1  ;;  %v40_v3 = vunpack.c.l.s4 %v211_v2  ;;  %v212_v5 = vmov 0.0   ;;  %v213_v7 = vmov 1966171168   ;;  %s214_s0 = smov [#allocation5]  }
  0x10   :  { %v43_v4 = vshrl.u32 %v42_v0, 7  ;;  %33 = vst [vmem:[#allocation5] sm:$0xcc] %v212_v5  ;;  %v73_v8 = vunpack.c.l.s4 %v213_v7  ;;  %v34_v10 = vld [vmem:[#allocation2] sm:$0x3]  ;;  %s140_s13 = sshll.u32 %s214_s0, 4  ;;  %s141_s13 = int_to_ptr.vmem [resolvable:$true] %s140_s13 }
  0x11   :  { %v41_v6 = vunpack.c.0.s8 %v40_v3  ;;  %v35_v11 = vld [vmem:[#allocation2 + $0x2] sm:$0x3]  ;;  %s183_s14 = scalar_lea.vmem %s141_s13, 128  ;;  %p188_p6 = scmp.lt.s32.totalorder %s141_s13, %s141_s13 }
  0x12   :  { %v74_v14 = vunpack.c.0.s8 %v73_v8  ;;  %p184_p5 = scmp.ne.s32.totalorder %s141_s13, %s183_s14  ;;  %p189_p7 = scmp.lt.s32.totalorder %s183_s14, %s183_s14 }
  0x13   :  { %v44_v9 = vsub.s32 %v41_v6, %v43_v4 }
  0x14   :  { %v77_v18 = vsub.s32 %v74_v14, %v43_v4  ;;  %p190_p8 = por %p189_p7, %p188_p6 }
  0x15   :  { %v45_v12 = vrot.slane %v34_v10, %v44_v9  ;;  %v52_v13 = vrot.slane %v35_v11, %v44_v9 }
  0x16   :  { %v36_v16 = vld [vmem:[#allocation5] sm:$0x33]  ;;  %p191_p9 = pnand %p190_p8, %p184_p5 }
  0x17   :  { %v53_v15 = vcombine.low %v45_v12, %v52_v13  ;;  %v63_v38 = vld [vmem:[#allocation5] sm:$0xcc] }
  0x19   :  { %v60_v17 = vrot.slane %v53_v15, %v44_v9 }
  0x1b   :  { %v62_v19 = vmax.f32 %v36_v16, %v60_v17 }
  0x1d   :  { %v78_v20 = vrot.slane %v62_v19, %v77_v18  ;;  %133 = vst [vmem:[#allocation5] sm:$0x33] %v62_v19  ;;  %v64_v21 = vsub.f32 %v36_v16, %v62_v19 }
  0x1f   :  { %v79_v22 = vcombine.high %v78_v20, %v78_v20  ;;  %v86_v23 = vrot.slane %v78_v20, %v77_v18  ;;  %v65_v26 = vmul.f32 1.442695, %v64_v21 }
  0x21   :  { %v93_v24 = vrot.slane %v79_v22, %v77_v18  ;;  %v96_v25 = vsub.f32 %v34_v10, %v86_v23 }
  0x23   :  { %v97_v27 = vsub.f32 %v35_v11, %v93_v24  ;;  %v98_v28 = vmul.f32 1.442695, %v96_v25 }
  0x25   :  { %157 = vpow2.f32 %v98_v28  ;;  %v100_v29 = vmul.f32 1.442695, %v97_v27 }
  0x26   :  { %159 = vpow2.f32 %v65_v26 }
  0x27   :  { %161 = vpow2.f32 %v100_v29 }
  0x32   :  { %v158_v30 = vpop.eup %157 }
  0x33   :  { %v160_v31 = vpop.eup %159  ;;  %v106_v32 = vcombine.low %v158_v30, %v158_v30 }
  0x34   :  { %v162_v33 = vpop.eup %161  ;;  %v68_v35 = vrot.slane %v160_v31, 6 }
  0x35   :  { %v107_v34 = vcombine.low %v162_v33, %v162_v33  ;;  %v114_v36 = vrot.slane %v106_v32, %v44_v9 }
  0x36   :  { %v70_v40 = vmul.f32 %v68_v35, %v63_v38 }
  0x37   :  { %v121_v37 = vrot.slane %v107_v34, %v44_v9 }
  0x39   :  { %v122_v39 = vcombine.low %v114_v36, %v121_v37 }
  0x3b   :  { %v129_v41 = vrot.slane %v122_v39, %v44_v9 }
  0x3d   :  { %v131_v42 = vadd.f32 %v129_v41, %v70_v40 }
  0x3f   :  { %132 = vst [vmem:[#allocation5] sm:$0xcc] %v131_v42 }
  0x40   :  { %194 = shalt.err (!%p191_p9)
}
  0x41   :  { %143 = dma.vmem_to_hbm [thread:$0]  %s141_s13, 128, %s232_s1, [#allocation4]  }
  0x42   :  { %205 = dma.done.wait [#allocation4], 128  }
  0x43   :  { %206 = vsyncadd [#allocation4], 4294967168 }
  0x44   :  { %147 = vsyncpa [#allocation3], 1 }
  0x45   :  { %148 = vsyncpa [#allocation4], 1 }

</bundles_post_ra>
